<compile_context>
chip_gen: v7x
topology: tpu7x:2x2x1
jax: 0.10.0
libtpu: 0.0.40
codegen_flags: <defaults>
</compile_context>

<pallas_src>
import functools

import jax
import jax.numpy as jnp
from jax import lax
from jax.experimental import pallas as pl
from jax.experimental.pallas import tpu as pltpu


def _phi_mlp_kernel(x_ref, w1_ref, b1_ref, w2_ref, b2_ref, o_ref, acc_ref):
    """One (row-tile, hidden-tile) step of out = gelu(x @ W1^T + b1) @ W2^T + b2."""
    j = pl.program_id(1)

    @pl.when(j == 0)
    def _():
        acc_ref[...] = jnp.zeros_like(acc_ref)

    # fc1 partial:  x (tm, D)  ·  W1_tile (th, D)  -> (tm, th), f32 accumulate.
    h = lax.dot_general(
        x_ref[...], w1_ref[...],
        dimension_numbers=(((1,), (1,)), ((), ())),
        preferred_element_type=jnp.float32,
    )
    h = h + b1_ref[...].astype(jnp.float32)

    # Exact GELU (matches torch.nn.GELU(approximate='none')).
    inv_sqrt2 = jnp.float32(0.7071067811865476)
    h = 0.5 * h * (1.0 + lax.erf(h * inv_sqrt2))

    # fc2 partial:  h (tm, th)  ·  W2_tile (D, th)  -> accumulate (tm, D) in f32.
    h = h.astype(w2_ref.dtype)
    acc_ref[...] += lax.dot_general(
        h, w2_ref[...],
        dimension_numbers=(((1,), (1,)), ((), ())),
        preferred_element_type=jnp.float32,
    )

    @pl.when(j == pl.num_programs(1) - 1)
    def _():
        o_ref[...] = (acc_ref[...] + b2_ref[...].astype(jnp.float32)).astype(
            o_ref.dtype)


def _pick_h_tile(H, target=512):
    """Hidden-dim tile: full H if small, else a lane-friendly divisor of H."""
    if H <= target:
        return H
    for t in (target, 256, 128):
        if H % t == 0:
            return t
    return H  # fallback: keep H resident (rare, non-128-multiple hidden dims)


@functools.partial(jax.jit, static_argnames=("tm_max",))
def phi_mlp(x, w1, b1, w2, b2, *, tm_max=256):
    """x: (B, S, D); w1: (H, D); b1: (H,); w2: (D, H); b2: (D,) — PyTorch layouts."""
    B, S, D = x.shape
    H = w1.shape[0]
    N = B * S

    # Row tile: multiple of 8 sublanes, capped at tm_max; pad ragged tail rows.
    tm = min(tm_max, ((N + 7) // 8) * 8)
    n_pad = pl.cdiv(N, tm) * tm

    xf = x.reshape(N, D)
    if n_pad != N:
        xf = jnp.pad(xf, ((0, n_pad - N), (0, 0)))

    th = _pick_h_tile(H)

    b1r = b1.reshape(1, H)
    b2r = b2.reshape(1, D)

    grid = (n_pad // tm, H // th)

    flops = 2 * n_pad * D * H * 2           # fc1 + fc2
    bytes_accessed = (
        xf.size * xf.dtype.itemsize
        + w1.size * w1.dtype.itemsize
        + w2.size * w2.dtype.itemsize
        + b1.size * b1.dtype.itemsize
        + b2.size * b2.dtype.itemsize
        + n_pad * D * x.dtype.itemsize
    )

    out = pl.pallas_call(
        _phi_mlp_kernel,
        out_shape=jax.ShapeDtypeStruct((n_pad, D), x.dtype),
        grid_spec=pltpu.PrefetchScalarGridSpec(
            num_scalar_prefetch=0,
            grid=grid,
            in_specs=[
                pl.BlockSpec((tm, D), lambda i, j: (i, 0)),   # x row tile
                pl.BlockSpec((th, D), lambda i, j: (j, 0)),   # W1 tile (H-streamed)
                pl.BlockSpec((1, th), lambda i, j: (0, j)),   # b1 tile
                pl.BlockSpec((D, th), lambda i, j: (0, j)),   # W2 tile (H-streamed)
                pl.BlockSpec((1, D), lambda i, j: (0, 0)),    # b2 (resident)
            ],
            out_specs=pl.BlockSpec((tm, D), lambda i, j: (i, 0)),
            scratch_shapes=[pltpu.VMEM((tm, D), jnp.float32)],
        ),
        compiler_params=pltpu.CompilerParams(
            dimension_semantics=("parallel", "arbitrary"),
        ),
        cost_estimate=pl.CostEstimate(
            flops=flops,
            transcendentals=n_pad * H,
            bytes_accessed=bytes_accessed,
        ),
    )(xf, w1, b1r, w2, b2r)

    return out[:N].reshape(B, S, D)


def _reference(x, w1, b1, w2, b2):
    h = jnp.einsum("bsd,hd->bsh", x, w1) + b1
    h = 0.5 * h * (1.0 + lax.erf(h / jnp.sqrt(2.0)))
    return jnp.einsum("bsh,dh->bsd", h, w2) + b2


if __name__ == "__main__":
    # Small shapes consistent with the module's forward: x (batch, seq, input_dim)
    batch, seq, input_dim, hidden_dim = 2, 8, 32, 64

    key = jax.random.PRNGKey(0)
    kx, k1, k2, k3, k4 = jax.random.split(key, 5)

    x = jax.random.normal(kx, (batch, seq, input_dim), dtype=jnp.float32)
    # Deterministic parameter init (shapes follow nn.Linear: (out, in) + (out,))
    w1 = jax.random.normal(k1, (hidden_dim, input_dim), dtype=jnp.float32) * 0.05
    b1 = jax.random.normal(k2, (hidden_dim,), dtype=jnp.float32) * 0.05
    w2 = jax.random.normal(k3, (input_dim, hidden_dim), dtype=jnp.float32) * 0.05
    b2 = jax.random.normal(k4, (input_dim,), dtype=jnp.float32) * 0.05

    out = phi_mlp(x, w1, b1, w2, b2)
    jax.block_until_ready(out)

    ref = _reference(x, w1, b1, w2, b2)
    assert out.shape == (batch, seq, input_dim)
    assert jnp.allclose(out, ref, atol=1e-5, rtol=1e-5)

    print("KERNEL_OK")
</pallas_src>

<mosaic_0001>
module attributes {stable_mosaic.version = 11 : i64} {
  func.func @_phi_mlp_kernel(%arg0: i32, %arg1: i32, %arg2: memref<16x32xf32, #tpu.memory_space<vmem>>, %arg3: memref<64x32xf32, #tpu.memory_space<vmem>>, %arg4: memref<1x64xf32, #tpu.memory_space<vmem>>, %arg5: memref<32x64xf32, #tpu.memory_space<vmem>>, %arg6: memref<1x32xf32, #tpu.memory_space<vmem>>, %arg7: memref<16x32xf32, #tpu.memory_space<vmem>>, %arg8: memref<16x32xf32, #tpu.memory_space<vmem>>) attributes {dimension_semantics = [#tpu.dimension_semantics<parallel>, #tpu.dimension_semantics<arbitrary>], iteration_bounds = array<i64: 1, 1>, scalar_prefetch = 0 : i64, scratch_operands = 1 : i64, tpu.core_type = #tpu.core_type<tc>, window_params = [{transform_indices = @transform_0, window_bounds = array<i64: 16, 32>}, {transform_indices = @transform_1, window_bounds = array<i64: 64, 32>}, {transform_indices = @transform_2, window_bounds = array<i64: 1, 64>}, {transform_indices = @transform_3, window_bounds = array<i64: 32, 64>}, {pipeline_mode = #tpu.pipeline_mode<synchronous>, transform_indices = @transform_4, window_bounds = array<i64: 1, 32>}, {transform_indices = @transform_5, window_bounds = array<i64: 16, 32>}]} {
    %c0_i32 = arith.constant 0 : i32
    %0 = arith.cmpi eq, %arg1, %c0_i32 : i32
    %1 = arith.extui %0 : i1 to i32
    %c0_i32_0 = arith.constant 0 : i32
    %2 = arith.cmpi ne, %1, %c0_i32_0 : i32
    scf.if %2 {
      %cst_18 = arith.constant 0.000000e+00 : f32
      %25 = vector.broadcast %cst_18 : f32 to vector<16x32xf32>
      %c0_19 = arith.constant 0 : index
      %c0_20 = arith.constant 0 : index
      %26 = vector.load %arg8[%c0_19, %c0_20] : memref<16x32xf32, #tpu.memory_space<vmem>>, vector<16x32xf32>
      tpu.vector_store %arg8[%c0_19, %c0_20], %25 {strides = array<i32>} : memref<16x32xf32, #tpu.memory_space<vmem>>, vector<16x32xf32>,
    } else {
    }
    %c0 = arith.constant 0 : index
    %c0_1 = arith.constant 0 : index
    %3 = vector.load %arg2[%c0, %c0_1] : memref<16x32xf32, #tpu.memory_space<vmem>>, vector<16x32xf32>
    %c0_2 = arith.constant 0 : index
    %c0_3 = arith.constant 0 : index
    %4 = vector.load %arg3[%c0_2, %c0_3] : memref<64x32xf32, #tpu.memory_space<vmem>>, vector<64x32xf32>
    %cst = arith.constant dense<0.000000e+00> : vector<16x64xf32>
    %5 = tpu.matmul %3, %4, %cst {dimension_numbers = #tpu.dot_dimension_numbers<[1], [1], [0], [0], [0, 0, 1, 0], [], []>} : vector<16x32xf32>, vector<64x32xf32>, vector<16x64xf32> -> vector<16x64xf32>
    %c0_4 = arith.constant 0 : index
    %c0_5 = arith.constant 0 : index
    %6 = vector.load %arg4[%c0_4, %c0_5] : memref<1x64xf32, #tpu.memory_space<vmem>>, vector<1x64xf32>
    %7 = vector.broadcast %6 : vector<1x64xf32> to vector<16x64xf32>
    %8 = arith.addf %5, %7 : vector<16x64xf32>
    %cst_6 = arith.constant 5.000000e-01 : f32
    %9 = vector.broadcast %cst_6 : f32 to vector<16x64xf32>
    %10 = arith.mulf %9, %8 : vector<16x64xf32>
    %cst_7 = arith.constant 0.707106769 : f32
    %11 = vector.broadcast %cst_7 : f32 to vector<16x64xf32>
    %12 = arith.mulf %8, %11 : vector<16x64xf32>
    %13 = math.erf %12 : vector<16x64xf32>
    %cst_8 = arith.constant 1.000000e+00 : f32
    %14 = vector.broadcast %cst_8 : f32 to vector<16x64xf32>
    %15 = arith.addf %14, %13 : vector<16x64xf32>
    %16 = arith.mulf %10, %15 : vector<16x64xf32>
    %c0_9 = arith.constant 0 : index
    %c0_10 = arith.constant 0 : index
    %17 = vector.load %arg8[%c0_9, %c0_10] : memref<16x32xf32, #tpu.memory_space<vmem>>, vector<16x32xf32>
    %c0_11 = arith.constant 0 : index
    %c0_12 = arith.constant 0 : index
    %18 = vector.load %arg5[%c0_11, %c0_12] : memref<32x64xf32, #tpu.memory_space<vmem>>, vector<32x64xf32>
    %cst_13 = arith.constant dense<0.000000e+00> : vector<16x32xf32>
    %19 = tpu.matmul %16, %18, %cst_13 {dimension_numbers = #tpu.dot_dimension_numbers<[1], [1], [0], [0], [0, 0, 1, 0], [], []>} : vector<16x64xf32>, vector<32x64xf32>, vector<16x32xf32> -> vector<16x32xf32>
    %20 = arith.addf %17, %19 : vector<16x32xf32>
    %c0_14 = arith.constant 0 : index
    %c0_15 = arith.constant 0 : index
    %21 = vector.load %arg8[%c0_14, %c0_15] : memref<16x32xf32, #tpu.memory_space<vmem>>, vector<16x32xf32>
    tpu.vector_store %arg8[%c0_14, %c0_15], %20 {strides = array<i32>} : memref<16x32xf32, #tpu.memory_space<vmem>>, vector<16x32xf32>,
    %c0_i32_16 = arith.constant 0 : i32
    %22 = arith.cmpi eq, %arg1, %c0_i32_16 : i32
    %23 = arith.extui %22 : i1 to i32
    %c0_i32_17 = arith.constant 0 : i32
    %24 = arith.cmpi ne, %23, %c0_i32_17 : i32
    scf.if %24 {
      %c0_18 = arith.constant 0 : index
      %c0_19 = arith.constant 0 : index
      %25 = vector.load %arg8[%c0_18, %c0_19] : memref<16x32xf32, #tpu.memory_space<vmem>>, vector<16x32xf32>
      %c0_20 = arith.constant 0 : index
      %c0_21 = arith.constant 0 : index
      %26 = vector.load %arg6[%c0_20, %c0_21] : memref<1x32xf32, #tpu.memory_space<vmem>>, vector<1x32xf32>
      %27 = vector.broadcast %26 : vector<1x32xf32> to vector<16x32xf32>
      %28 = arith.addf %25, %27 : vector<16x32xf32>
      %c0_22 = arith.constant 0 : index
      %c0_23 = arith.constant 0 : index
      %29 = vector.load %arg7[%c0_22, %c0_23] : memref<16x32xf32, #tpu.memory_space<vmem>>, vector<16x32xf32>
      tpu.vector_store %arg7[%c0_22, %c0_23], %28 {strides = array<i32>} : memref<16x32xf32, #tpu.memory_space<vmem>>, vector<16x32xf32>,
    } else {
    }
    return
  }
  func.func @transform_0(%arg0: i32, %arg1: i32) -> (i32, i32) {
    %c0_i32 = arith.constant 0 : i32
    %c0_i32_0 = arith.constant 0 : i32
    return %arg0, %c0_i32 : i32, i32
  }
  func.func @transform_1(%arg0: i32, %arg1: i32) -> (i32, i32) {
    %c0_i32 = arith.constant 0 : i32
    %c0_i32_0 = arith.constant 0 : i32
    return %arg1, %c0_i32 : i32, i32
  }
  func.func @transform_2(%arg0: i32, %arg1: i32) -> (i32, i32) {
    %c0_i32 = arith.constant 0 : i32
    %c0_i32_0 = arith.constant 0 : i32
    return %c0_i32, %arg1 : i32, i32
  }
  func.func @transform_3(%arg0: i32, %arg1: i32) -> (i32, i32) {
    %c0_i32 = arith.constant 0 : i32
    %c0_i32_0 = arith.constant 0 : i32
    return %c0_i32, %arg1 : i32, i32
  }
  func.func @transform_4(%arg0: i32, %arg1: i32) -> (i32, i32) {
    %c0_i32 = arith.constant 0 : i32
    %c0_i32_0 = arith.constant 0 : i32
    %c0_i32_1 = arith.constant 0 : i32
    return %c0_i32, %c0_i32_0 : i32, i32
  }
  func.func @transform_5(%arg0: i32, %arg1: i32) -> (i32, i32) {
    %c0_i32 = arith.constant 0 : i32
    %c0_i32_0 = arith.constant 0 : i32
    return %arg0, %c0_i32 : i32, i32
  }
}

</mosaic_0001>

<bundles_post_ra>
// kernel: phi_mlp.1
= control target key start
LH: loop header
LB: loop body
LE: loop exit
PB: predicated region body
PF: predicated region fallthrough
CT: control target
= control target key end

     0   :  { %vm25_vm0 = vcmask 261120   ;;  %s557_s0 = inlined_call_operand.vmem [shape: f32[16,32], index: 0, kind: input, shape index: {}]   ;;  %s558_s1 = inlined_call_operand.vmem [shape: f32[64,32], index: 1, kind: input, shape index: {}]   ;;  %s559_s2 = inlined_call_operand.vmem [shape: f32[1,64], index: 2, kind: input, shape index: {}]   ;;  %s560_s3 = inlined_call_operand.vmem [shape: f32[32,64], index: 3, kind: input, shape index: {}]   ;;  %s561_s4 = inlined_call_operand.vmem [shape: f32[1,32], index: 4, kind: input, shape index: {}]   ;;  %s562_s5 = inlined_call_operand.hbm [shape: f32[16,32], index: 5, kind: output, shape index: {}]  }
   0x1   :  { %v30_v0 = vld [vmem:[%s558_s1] sm:$0xff]  ;;  %v31_v1 = vld [vmem:[%s558_s1 + $0x8] sm:$0xff]  ;;  %v32_v2 = vld [vmem:[%s558_s1 + $0x10] sm:$0xff] }
   0x2   :  { %v361_v3 = vpack.c.bf16 %v31_v1, %v30_v0  ;;  %vm474_vm1 = vmpackc.low %vm25_vm0, %vm25_vm0  ;;  %v33_v5 = vld [vmem:[%s558_s1 + $0x18] sm:$0xff]  ;;  %v28_v7 = vld [vmem:[%s557_s0] sm:$0xff] }
   0x3   :  { %v367_v6 = vpack.c.bf16 %v33_v5, %v32_v2 }
   0x4   :  { %363 = vmatprep.subr.msk.bf16.mxu0 %vm474_vm1, %v361_v3 }
   0x5   :  { %10 = vsyncpa [#allocation4], 0  ;;  %366 = vmatpush3.bf16.xpose.msk.msra.mxu0 %vm474_vm1, %v361_v3  ;;  %347 = vmatprep.mubr.msk.f32.mxu0 %vm25_vm0, %v28_v7  ;;  %v34_v8 = vld [vmem:[%s558_s1 + $0x20] sm:$0xff]  ;;  %v35_v9 = vld [vmem:[%s558_s1 + $0x28] sm:$0xff]  ;;  %vm167_vm2 = vcmask 523264   ;;  %v429_v21 = vmov 0.0  }
   0x6   :  { %369 = vmatprep.subr.msk.bf16.mxu0 %vm474_vm1, %v367_v6  ;;  %v373_v10 = vpack.c.bf16 %v35_v9, %v34_v8  ;;  %v36_v11 = vld [vmem:[%s558_s1 + $0x30] sm:$0xff]  ;;  %v37_v12 = vld [vmem:[%s558_s1 + $0x38] sm:$0xff]  ;;  %v29_v14 = vld [vmem:[%s557_s0 + $0x8] sm:$0xff]  ;;  %27 = vst.msk [vmem:[#allocation2 + $0x8] sm:$0xff] %vm25_vm0, %v429_v21  ;;  %s430_s21 = smov [#allocation3]  }
   0x7   :  { %v379_v13 = vpack.c.bf16 %v37_v12, %v36_v11  ;;  %v163_v15 = vld [vmem:[%s560_s3] sm:$0xff]  ;;  %v164_v16 = vld [vmem:[%s560_s3 + $0x8] sm:$0xff]  ;;  %vm386_vm3 = vmpackc.low %vm167_vm2, %vm167_vm2  ;;  %26 = vst.msk [vmem:[#allocation2] sm:$0xff] %vm25_vm0, %v429_v21  ;;  %s286_s22 = sshll.u32 %s430_s21, 4  ;;  %s287_s22 = int_to_ptr.vmem [resolvable:$true] %s286_s22 }
   0x8   :  { %v385_v17 = vpack.c.bf16 %v164_v16, %v163_v15  ;;  %v165_v18 = vld [vmem:[%s560_s3 + $0x10] sm:$0xff]  ;;  %v166_v19 = vld [vmem:[%s560_s3 + $0x18] sm:$0xff]  ;;  %v297_v22 = vld [vmem:[%s559_s2] ss:$0 sm:$0xff]  ;;  %s405_s23 = scalar_lea.vmem %s287_s22, 256  ;;  %p410_p1 = scmp.lt.s32.totalorder %s287_s22, %s287_s22 }
   0x9   :  { %v391_v20 = vpack.c.bf16 %v166_v19, %v165_v18  ;;  %v314_v43 = vld [vmem:[%s561_s4] ss:$0 sm:$0xff]  ;;  %p406_p0 = scmp.ne.s32.totalorder %s287_s22, %s405_s23  ;;  %p411_p2 = scmp.lt.s32.totalorder %s405_s23, %s405_s23 }
   0xa   :  { %387 = vmatprep.subr.msk.bf16.mxu1 %vm386_vm3, %v385_v17 }
   0xb   :  { %390 = vmatpush3.bf16.xpose.msk.msra.mxu1 %vm386_vm3, %v385_v17  ;;  %p412_p3 = por %p411_p2, %p410_p1 }
   0xc   :  { %393 = vmatprep.subr.msk.bf16.mxu1 %vm386_vm3, %v391_v20 }
   0xd   :  { %372 = vmatpush3.bf16.xpose.msk.msra.mxu0 %vm474_vm1, %v367_v6  ;;  %v162_v37 = vld [vmem:[#allocation2 + $0x8] sm:$0xff]  ;;  %p413_p4 = pnand %p412_p3, %p406_p0 }
   0xe   :  { %375 = vmatprep.subr.msk.bf16.mxu0 %vm474_vm1, %v373_v10  ;;  %v161_v38 = vld [vmem:[#allocation2] sm:$0xff] }
  0x13   :  { %396 = vmatpush3.bf16.xpose.msk.msra.mxu1 %vm386_vm3, %v391_v20 }
  0x15   :  { %378 = vmatpush3.bf16.xpose.msk.msra.mxu0 %vm474_vm1, %v373_v10 }
  0x16   :  { %381 = vmatprep.subr.msk.bf16.mxu0 %vm474_vm1, %v379_v13 }
  0x1d   :  { %384 = vmatpush3.bf16.xpose.msk.msra.mxu0 %vm474_vm1, %v379_v13 }
  0x24   :  { %348 = vmatmul.mubr.msk.f32.vlgmr.msra.gmra.mrb[0].mxu0 %vm25_vm0, %v29_v14 }
  0xf7   :  { %v349_v23 = vpop.f32.mrb[0].mxu0 }
  0xf8   :  { %v148_v24 = vadd.f32 %v349_v23, %v297_v22  ;;  %v142_v25 = vpop.f32.mrb[1].mxu0 }
  0xf9   :  { %v143_v26 = vadd.f32 %v297_v22, %v142_v25 }
  0xfa   :  { %v154_v27 = vmul.f32 0.70710677, %v148_v24  ;;  %v152_v34 = vmul.f32 0.5, %v148_v24 }
  0xfb   :  { %v153_v28 = vmul.f32 0.70710677, %v143_v26  ;;  %v151_v32 = vmul.f32 0.5, %v143_v26 }
  0xfc   :  { %401 = verf.f32 %v154_v27 }
  0xfd   :  { %403 = verf.f32 %v153_v28 }
 0x106   :  { %v402_v29 = vpop.eup %401 }
 0x107   :  { %v404_v30 = vpop.eup %403  ;;  %v158_v31 = vadd.f32 1.0, %v402_v29 }
 0x108   :  { %v157_v33 = vadd.f32 1.0, %v404_v30 }
 0x109   :  { %v160_v36 = vmul.f32 %v158_v31, %v152_v34 }
 0x10a   :  { %v159_v35 = vmul.f32 %v157_v33, %v151_v32 }
 0x10c   :  { %358 = vmatprep.mubr.msk.f32.mxu1 %vm167_vm2, %v159_v35 }
 0x10d   :  { %359 = vmatmul.mubr.msk.f32.vlgmr.msra.gmra.mrb[0].mxu1 %vm167_vm2, %v160_v36 }
 0x1e0   :  { %v360_v39 = vpop.f32.mrb[0].mxu1 }
 0x1e1   :  { %v262_v40 = vadd.f32 %v360_v39, %v162_v37  ;;  %v252_v41 = vpop.f32.mrb[1].mxu1 }
 0x1e2   :  { %v261_v42 = vadd.f32 %v252_v41, %v161_v38 }
 0x1e3   :  { %264 = vst.msk [vmem:[#allocation2 + $0x8] sm:$0xff] %vm25_vm0, %v262_v40 }
 0x1e4   :  { %263 = vst.msk [vmem:[#allocation2] sm:$0xff] %vm25_vm0, %v261_v42 }
 0x1ea   :  { %v269_v44 = vld [vmem:[#allocation2 + $0x8] sm:$0xff] }
 0x1eb   :  { %v268_v45 = vld [vmem:[#allocation2] sm:$0xff]  ;;  %v278_v46 = vadd.f32 %v314_v43, %v269_v44 }
 0x1ec   :  { %v277_v47 = vadd.f32 %v314_v43, %v268_v45 }
 0x1ed   :  { %280 = vst.msk [vmem:[#allocation3 + $0x8] sm:$0xff] %vm25_vm0, %v278_v46 }
 0x1ee   :  { %279 = vst.msk [vmem:[#allocation3] sm:$0xff] %vm25_vm0, %v277_v47 }
 0x1ef   :  { %416 = shalt.err (!%p413_p4)
}
 0x1f0   :  { %s417_s25 = scalar_lea.hbm %s562_s5, 256 }
 0x1f1   :  { %p418_p5 = scmp.ne.s32.totalorder %s562_s5, %s417_s25  ;;  %p421_p6 = scmp.lt.u32.totalorder %s417_s25, %s562_s5 }
 0x1f3   :  { %p423_p7 = pnand %p421_p6, %p418_p5 }
 0x1f5   :  { %426 = shalt.err (!%p423_p7)
}
 0x1f6   :  { %s431_s30 = smov 128   ;;  %s432_s6 = smov 8  }
 0x1f7   :  { %292 = dma.vmem_to_hbm [thread:$0]  %s287_s22, 256, %s562_s5, [#allocation4], %s431_s30, %s431_s30, %s432_s6  }
 0x1f8   :  { %427 = dma.done.wait [#allocation4], 256  }
 0x1f9   :  { %428 = vsyncadd [#allocation4], 4294967040 }
 0x1fa   :  { %296 = vsyncpa [#allocation4], 1 }

</bundles_post_ra>
